<compile_context>
chip_gen: v5e
topology: v5e:2x2
jax: 0.10.0
libtpu: 0.0.40
codegen_flags: <defaults>
</compile_context>

<pallas_src>
import math
import jax
import jax.numpy as jnp
from jax.experimental import pallas as pl
from jax.experimental.pallas import tpu as pltpu


def _hotor_kernel(wd_ref, u_ref, d_ref, sc_ref, out_ref):
    t = pl.program_id(1)  # tile index within this core's chunk (reduction axis)

    # Upcast inside the kernel so HBM traffic stays at the table dtype.
    u = u_ref[...].astype(jnp.float32)      # (Dp, TB)  U[u] rows, transposed
    d = d_ref[...].astype(jnp.float32)      # (Dp, TB)  V[i] - V[j], transposed
    sc = sc_ref[...]                        # (8, TB)  f32 scalar pack
    barr = sc[0:1, :]                       # rating margin
    bb = sc[1:2, :]                         # (biasI - biasJ) * barr
    wreg = sc[2:3, :]                       # wd * (||i||^2 + ||j||^2 + biasI^2 + biasJ^2)
    mask = sc[3:4, :]                       # 1 for real rows, 0 for padding
    wd = wd_ref[0]                          # SMEM scalar

    # Offload the two per-column reductions to the (otherwise idle) MXU:
    # ones(8, Dp) @ (Dp, TB) -> (8, TB); every row equals the column sum,
    # keep row 0.  Results are lane-dense (1, TB).
    dp = u.shape[0]
    ones_lhs = jnp.ones((8, dp), jnp.float32)
    dotp = jnp.dot(ones_lhs, u * d, preferred_element_type=jnp.float32)[0:1, :]  # <u, i-j>
    usq = jnp.dot(ones_lhs, u * u, preferred_element_type=jnp.float32)[0:1, :]   # ||u||^2

    # Lane-dense scalar chain on (1, TB).
    r_uij = dotp * barr + bb
    z = -r_uij
    # -log(sigmoid(x)) = softplus(-x), numerically stable form.
    nll = jnp.maximum(z, 0.0) + jnp.log(1.0 + jnp.exp(-jnp.abs(z)))
    per_col = mask * (nll + wd * usq + wreg)            # (1, TB); padding -> 0
    tile_sum = jnp.sum(per_col, axis=1, keepdims=True)  # (1, 1)

    # Resident per-core accumulator block (zero at this core's first tile).
    @pl.when(t == 0)
    def _():
        out_ref[...] = jnp.zeros_like(out_ref)

    out_ref[...] = out_ref[...] + tile_sum.reshape(1, 1, 1)


def _round_up(x, m):
    return ((x + m - 1) // m) * m


def _device_budgets():
    """(double-buffered input budget, vmem_limit_bytes) per TPU generation."""
    kind = ""
    try:
        kind = jax.devices()[0].device_kind.lower()
    except Exception:
        pass
    if "v5 lite" in kind or "v5e" in kind:
        return 10 * 2**20, 28 * 2**20      # 16 MiB default scoped / 128 MiB physical
    if "v6" in kind:
        return 32 * 2**20, 96 * 2**20      # 128 MiB physical
    if "v7" in kind:
        return 20 * 2**20, 48 * 2**20      # only 64 MiB physical per TensorCore
    return 12 * 2**20, 32 * 2**20          # conservative fallback


def _choose_tile(batch, dp, emb_itemsize, nc, input_budget_bytes):
    """Largest lane tile (multiple of 128) whose double-buffered inputs fit."""
    # Per lane-column per grid step: 2 embedding streams (Dp elements each) in
    # table dtype + (8,) f32 scalar pack, each double-buffered.
    per_col = 2 * (2 * dp * emb_itemsize) + 2 * (8 * 4)
    cap = input_budget_bytes // max(per_col, 1)
    cap = max(128, (cap // 128) * 128)
    cap = min(cap, 8192)
    per_core = -(-batch // nc)                       # ceil(batch / nc)
    want = max(128, _round_up(per_core, 128))
    return min(cap, want)


def hotor_forward(U, V, biasV, u_idx, i_idx, j_idx, r_ui, weight_decay):
    """HoToR loss.  Row gathers + per-example scalar precompute are XLA glue
    (they fuse with the gathers); the dot product, softplus and reductions run
    in the Pallas kernel on a lane-dense (D, TB) layout."""
    B = u_idx.shape[0]
    D = U.shape[1]
    emb_dtype = U.dtype
    itemsize = jnp.dtype(emb_dtype).itemsize

    NC = 2                                   # v7x TensorCores; harmless on v5e/v6e
    input_budget, vmem_limit = _device_budgets()
    Dp = _round_up(D, 8)
    TB = _choose_tile(B, Dp, itemsize, NC, input_budget)
    per_core = -(-B // NC)
    T = max(1, -(-per_core // TB))
    B_pad = NC * T * TB
    pad_b = B_pad - B
    pad_d = Dp - D

    # ---- XLA glue: row gathers + per-example precompute (fuses with gathers).
    u_emb = jnp.take(U, u_idx, axis=0)       # (B, D) table dtype
    i_emb = jnp.take(V, i_idx, axis=0)
    j_emb = jnp.take(V, j_idx, axis=0)
    diff = i_emb - j_emb                     # only u and diff are streamed

    i32 = i_emb.astype(jnp.float32)
    j32 = j_emb.astype(jnp.float32)
    bi = biasV[i_idx].astype(jnp.float32)
    bj = biasV[j_idx].astype(jnp.float32)
    r = r_ui.astype(jnp.float32)
    # barr_ui = 1 if r == 5 else (2^r - 1) / 2^5
    barr = jnp.where(r == 5.0, 1.0, (jnp.exp2(r) - 1.0) * (1.0 / 32.0))
    bb = (bi - bj) * barr
    wreg = weight_decay * (jnp.sum(i32 * i32 + j32 * j32, axis=1) + bi * bi + bj * bj)
    mask = jnp.ones((B,), jnp.float32)
    zeros = jnp.zeros((B,), jnp.float32)
    # 8 sublane rows for clean (8,128) tiling; rows 4..7 are padding.
    scalars = jnp.stack([barr, bb, wreg, mask, zeros, zeros, zeros, zeros], axis=0)
    scalars = jnp.pad(scalars, ((0, 0), (0, pad_b)))            # (8, B_pad)

    # Transposed, lane-dense layout: batch on lanes, feature dim on sublanes.
    u_t = jnp.pad(u_emb.T, ((0, pad_d), (0, pad_b)))            # (Dp, B_pad)
    d_t = jnp.pad(diff.T, ((0, pad_d), (0, pad_b)))             # (Dp, B_pad)

    wd = jnp.asarray([weight_decay], jnp.float32)               # SMEM scalar

    out = pl.pallas_call(
        _hotor_kernel,
        out_shape=jax.ShapeDtypeStruct((NC, 1, 1), jnp.float32),
        grid=(NC, T),
        in_specs=[
            pl.BlockSpec(memory_space=pltpu.MemorySpace.SMEM),      # weight_decay
            pl.BlockSpec((Dp, TB), lambda c, t: (0, c * T + t)),    # U[u]   (transposed)
            pl.BlockSpec((Dp, TB), lambda c, t: (0, c * T + t)),    # V[i]-V[j]
            pl.BlockSpec((8, TB), lambda c, t: (0, c * T + t)),     # scalar pack
        ],
        out_specs=pl.BlockSpec((1, 1, 1), lambda c, t: (c, 0, 0)),  # per-core resident acc
        compiler_params=pltpu.CompilerParams(
            dimension_semantics=("parallel", "arbitrary"),
            vmem_limit_bytes=vmem_limit),
    )(wd, u_t, d_t, scalars)
    return jnp.sum(out)                      # sum the per-core partials


def hotor_reference(U, V, biasV, u_idx, i_idx, j_idx, r_ui, weight_decay):
    """Pure-JAX reference mirroring the PyTorch forward."""
    u = U[u_idx, :]
    i = V[i_idx, :]
    j = V[j_idx, :]
    biasI = biasV[i_idx]
    biasJ = biasV[j_idx]
    x_ui = jnp.sum(u * i, axis=1) + biasI
    x_uj = jnp.sum(u * j, axis=1) + biasJ
    r_uij = x_ui - x_uj
    barr = jnp.where(r_ui == 5.0, 1.0,
                     (jnp.exp2(r_ui.astype(jnp.float32)) - 1.0) / 32.0)
    r_uij = r_uij * barr
    log_prob = jnp.sum(jnp.log(jax.nn.sigmoid(r_uij)))
    reg = weight_decay * (
        jnp.sum(jnp.linalg.norm(u, axis=1) ** 2)
        + jnp.sum(jnp.linalg.norm(i, axis=1) ** 2)
        + jnp.sum(jnp.linalg.norm(j, axis=1) ** 2)
        + jnp.sum(biasI ** 2)
        + jnp.sum(biasJ ** 2)
    )
    return -log_prob + reg


if __name__ == "__main__":
    key = jax.random.PRNGKey(0)
    user_size, item_size, dim = 16, 32, 32
    batch = 8
    weight_decay = 0.025

    k_u, k_v, k_b, k_ui, k_ii, k_ji, k_r = jax.random.split(key, 7)

    # Deterministic parameter init mimicking the module's __init__:
    # xavier_normal_ for U, V; normal(mean=0.001) for biasV.
    std_u = math.sqrt(2.0 / (user_size + dim))
    std_v = math.sqrt(2.0 / (item_size + dim))
    U = jax.random.normal(k_u, (user_size, dim), jnp.float32) * std_u
    V = jax.random.normal(k_v, (item_size, dim), jnp.float32) * std_v
    biasV = 0.001 + jax.random.normal(k_b, (item_size,), jnp.float32)

    # Batch of (user, positive item, rating, negative item).
    u_idx = jax.random.randint(k_ui, (batch,), 0, user_size)
    i_idx = jax.random.randint(k_ii, (batch,), 0, item_size)
    j_idx = jax.random.randint(k_ji, (batch,), 0, item_size)
    r_ui = jax.random.randint(k_r, (batch,), 1, 6).astype(jnp.float32)  # ratings 1..5

    loss = hotor_forward(U, V, biasV, u_idx, i_idx, j_idx, r_ui, weight_decay)
    loss = jax.block_until_ready(loss)

    ref = hotor_reference(U, V, biasV, u_idx, i_idx, j_idx, r_ui, weight_decay)
    # Tolerance allows for MXU f32 pass-count differences across TPU
    # generations on the <u, i-j> / ||u||^2 dots (agreement is ~1e-6 when the
    # Mosaic default full-precision f32 matmul is used).
    assert jnp.allclose(loss, ref, rtol=2e-3, atol=1e-3), (loss, ref)

    print("KERNEL_OK")
</pallas_src>

<mosaic_0001>
module attributes {stable_mosaic.version = 11 : i64} {
  func.func @_hotor_kernel(%arg0: i32, %arg1: i32, %arg2: memref<1xf32, #tpu.memory_space<smem>>, %arg3: memref<32x128xf32, #tpu.memory_space<vmem>>, %arg4: memref<32x128xf32, #tpu.memory_space<vmem>>, %arg5: memref<8x128xf32, #tpu.memory_space<vmem>>, %arg6: memref<1x1x1xf32, #tpu.memory_space<vmem>>) attributes {dimension_semantics = [#tpu.dimension_semantics<parallel>, #tpu.dimension_semantics<arbitrary>], iteration_bounds = array<i64: 2, 1>, scalar_prefetch = 0 : i64, scratch_operands = 0 : i64, tpu.core_type = #tpu.core_type<tc>, window_params = [{transform_indices = @transform_0, window_bounds = array<i64: 1>}, {transform_indices = @transform_1, window_bounds = array<i64: 32, 128>}, {transform_indices = @transform_2, window_bounds = array<i64: 32, 128>}, {transform_indices = @transform_3, window_bounds = array<i64: 8, 128>}, {transform_indices = @transform_4, window_bounds = array<i64: 1, 1, 1>}]} {
    %c0 = arith.constant 0 : index
    %c0_0 = arith.constant 0 : index
    %0 = vector.load %arg3[%c0, %c0_0] : memref<32x128xf32, #tpu.memory_space<vmem>>, vector<32x128xf32>
    %c0_1 = arith.constant 0 : index
    %c0_2 = arith.constant 0 : index
    %1 = vector.load %arg4[%c0_1, %c0_2] : memref<32x128xf32, #tpu.memory_space<vmem>>, vector<32x128xf32>
    %c0_3 = arith.constant 0 : index
    %c0_4 = arith.constant 0 : index
    %2 = vector.load %arg5[%c0_3, %c0_4] : memref<8x128xf32, #tpu.memory_space<vmem>>, vector<8x128xf32>
    %3 = vector.extract_strided_slice %2 {offsets = [0, 0], sizes = [1, 128], strides = [1, 1]} : vector<8x128xf32> to vector<1x128xf32>
    %4 = vector.extract_strided_slice %2 {offsets = [1, 0], sizes = [1, 128], strides = [1, 1]} : vector<8x128xf32> to vector<1x128xf32>
    %5 = vector.extract_strided_slice %2 {offsets = [2, 0], sizes = [1, 128], strides = [1, 1]} : vector<8x128xf32> to vector<1x128xf32>
    %6 = vector.extract_strided_slice %2 {offsets = [3, 0], sizes = [1, 128], strides = [1, 1]} : vector<8x128xf32> to vector<1x128xf32>
    %c0_5 = arith.constant 0 : index
    %7 = memref.load %arg2[%c0_5] : memref<1xf32, #tpu.memory_space<smem>>
    %cst = arith.constant 1.000000e+00 : f32
    %8 = vector.broadcast %cst : f32 to vector<8x32xf32>
    %9 = arith.mulf %0, %1 : vector<32x128xf32>
    %cst_6 = arith.constant dense<0.000000e+00> : vector<8x128xf32>
    %10 = tpu.matmul %8, %9, %cst_6 {dimension_numbers = #tpu.dot_dimension_numbers<[1], [0], [0], [1], [0, 0, 1, 1], [], []>} : vector<8x32xf32>, vector<32x128xf32>, vector<8x128xf32> -> vector<8x128xf32>
    %11 = vector.extract_strided_slice %10 {offsets = [0, 0], sizes = [1, 128], strides = [1, 1]} : vector<8x128xf32> to vector<1x128xf32>
    %12 = arith.mulf %0, %0 : vector<32x128xf32>
    %cst_7 = arith.constant dense<0.000000e+00> : vector<8x128xf32>
    %13 = tpu.matmul %8, %12, %cst_7 {dimension_numbers = #tpu.dot_dimension_numbers<[1], [0], [0], [1], [0, 0, 1, 1], [], []>} : vector<8x32xf32>, vector<32x128xf32>, vector<8x128xf32> -> vector<8x128xf32>
    %14 = vector.extract_strided_slice %13 {offsets = [0, 0], sizes = [1, 128], strides = [1, 1]} : vector<8x128xf32> to vector<1x128xf32>
    %15 = arith.mulf %11, %3 : vector<1x128xf32>
    %16 = arith.addf %15, %4 : vector<1x128xf32>
    %cst_8 = arith.constant 0.000000e+00 : f32
    %17 = vector.broadcast %cst_8 : f32 to vector<1x128xf32>
    %18 = arith.subf %17, %16 : vector<1x128xf32>
    %cst_9 = arith.constant 0.000000e+00 : f32
    %19 = vector.broadcast %cst_9 : f32 to vector<1x128xf32>
    %20 = arith.maximumf %18, %19 : vector<1x128xf32>
    %21 = math.absf %18 : vector<1x128xf32>
    %cst_10 = arith.constant 0.000000e+00 : f32
    %22 = vector.broadcast %cst_10 : f32 to vector<1x128xf32>
    %23 = arith.subf %22, %21 : vector<1x128xf32>
    %24 = math.exp %23 : vector<1x128xf32>
    %cst_11 = arith.constant 1.000000e+00 : f32
    %25 = vector.broadcast %cst_11 : f32 to vector<1x128xf32>
    %26 = arith.addf %25, %24 : vector<1x128xf32>
    %27 = math.log %26 : vector<1x128xf32>
    %28 = arith.addf %20, %27 : vector<1x128xf32>
    %29 = vector.broadcast %7 : f32 to vector<1x128xf32>
    %30 = arith.mulf %29, %14 : vector<1x128xf32>
    %31 = arith.addf %28, %30 : vector<1x128xf32>
    %32 = arith.addf %31, %5 : vector<1x128xf32>
    %33 = arith.mulf %6, %32 : vector<1x128xf32>
    %cst_12 = arith.constant dense<0.000000e+00> : vector<1xf32>
    %34 = vector.multi_reduction <add>, %33, %cst_12 [1] : vector<1x128xf32> to vector<1xf32>
    %35 = vector.shape_cast %34 : vector<1xf32> to vector<1x1xf32>
    %c0_i32 = arith.constant 0 : i32
    %36 = arith.cmpi eq, %arg1, %c0_i32 : i32
    %37 = arith.extui %36 : i1 to i32
    %c0_i32_13 = arith.constant 0 : i32
    %38 = arith.cmpi ne, %37, %c0_i32_13 : i32
    scf.if %38 {
      %cst_20 = arith.constant 0.000000e+00 : f32
      %43 = vector.broadcast %cst_20 : f32 to vector<1x1x1xf32>
      %c0_21 = arith.constant 0 : index
      %c0_22 = arith.constant 0 : index
      %c0_23 = arith.constant 0 : index
      %44 = vector.load %arg6[%c0_21, %c0_22, %c0_23] : memref<1x1x1xf32, #tpu.memory_space<vmem>>, vector<1x1x1xf32>
      tpu.vector_store %arg6[%c0_21, %c0_22, %c0_23], %43 {strides = array<i32>} : memref<1x1x1xf32, #tpu.memory_space<vmem>>, vector<1x1x1xf32>,
    } else {
    }
    %c0_14 = arith.constant 0 : index
    %c0_15 = arith.constant 0 : index
    %c0_16 = arith.constant 0 : index
    %39 = vector.load %arg6[%c0_14, %c0_15, %c0_16] : memref<1x1x1xf32, #tpu.memory_space<vmem>>, vector<1x1x1xf32>
    %40 = vector.shape_cast %35 : vector<1x1xf32> to vector<1x1x1xf32>
    %41 = arith.addf %39, %40 : vector<1x1x1xf32>
    %c0_17 = arith.constant 0 : index
    %c0_18 = arith.constant 0 : index
    %c0_19 = arith.constant 0 : index
    %42 = vector.load %arg6[%c0_17, %c0_18, %c0_19] : memref<1x1x1xf32, #tpu.memory_space<vmem>>, vector<1x1x1xf32>
    tpu.vector_store %arg6[%c0_17, %c0_18, %c0_19], %41 {strides = array<i32>} : memref<1x1x1xf32, #tpu.memory_space<vmem>>, vector<1x1x1xf32>,
    return
  }
  func.func @transform_0(%arg0: i32, %arg1: i32) -> i32 {
    %c0_i32 = arith.constant 0 : i32
    %c0_i32_0 = arith.constant 0 : i32
    return %c0_i32 : i32
  }
  func.func @transform_1(%arg0: i32, %arg1: i32) -> (i32, i32) {
    %c1_i32 = arith.constant 1 : i32
    %0 = arith.muli %arg0, %c1_i32 : i32
    %1 = arith.addi %0, %arg1 : i32
    %c0_i32 = arith.constant 0 : i32
    %c0_i32_0 = arith.constant 0 : i32
    return %c0_i32, %1 : i32, i32
  }
  func.func @transform_2(%arg0: i32, %arg1: i32) -> (i32, i32) {
    %c1_i32 = arith.constant 1 : i32
    %0 = arith.muli %arg0, %c1_i32 : i32
    %1 = arith.addi %0, %arg1 : i32
    %c0_i32 = arith.constant 0 : i32
    %c0_i32_0 = arith.constant 0 : i32
    return %c0_i32, %1 : i32, i32
  }
  func.func @transform_3(%arg0: i32, %arg1: i32) -> (i32, i32) {
    %c1_i32 = arith.constant 1 : i32
    %0 = arith.muli %arg0, %c1_i32 : i32
    %1 = arith.addi %0, %arg1 : i32
    %c0_i32 = arith.constant 0 : i32
    %c0_i32_0 = arith.constant 0 : i32
    return %c0_i32, %1 : i32, i32
  }
  func.func @transform_4(%arg0: i32, %arg1: i32) -> (i32, i32, i32) {
    %c0_i32 = arith.constant 0 : i32
    %c0_i32_0 = arith.constant 0 : i32
    %c0_i32_1 = arith.constant 0 : i32
    return %arg0, %c0_i32, %c0_i32_0 : i32, i32, i32
  }
}

</mosaic_0001>

<bundles_post_ra>
// kernel: tpu_custom_call.1
= control target key start
LH: loop header
LB: loop body
LE: loop exit
PB: predicated region body
PF: predicated region fallthrough
CT: control target
= control target key end

     0   :  { %s933_s0 = inlined_call_operand.<no memory space> [shape: f32[1], index: 0, kind: input, shape index: {}]   ;;  %s934_s1 = inlined_call_operand.hbm [shape: f32[32,256], index: 1, kind: input, shape index: {}]   ;;  %s935_s2 = inlined_call_operand.hbm [shape: f32[32,256], index: 2, kind: input, shape index: {}]   ;;  %s936_s3 = inlined_call_operand.hbm [shape: f32[8,256], index: 3, kind: input, shape index: {}]   ;;  %s937_s4 = inlined_call_operand.vmem [shape: f32[2,1,1], index: 4, kind: output, shape index: {}]  }
   0x1   :  { %941 = sst [smem:[#allocation13_spill]] %s935_s2 }
   0x2   :  { %9 = sst [smem:[#allocation2]] %s933_s0 }
   0x3   :  { %10 = vsyncpa [#allocation4], 0 }
   0x4   :  { %12 = vsyncpa [#allocation4 + $0x1], 0 }
   0x5   :  { %13 = vsyncpa [#allocation6], 0 }
   0x6   :  { %15 = vsyncpa [#allocation6 + $0x1], 0  ;;  %s805_s17 = smov 0   ;;  %s807_s18 = smov 0  }
   0x7   :  { %s809_s19 = smov 0   ;;  %s811_s20 = smov 0  }
   0x8   :  { %s813_s21 = smov 0   ;;  %s815_s22 = smov 0  }
   0x9 LB: > { %942 = sst [smem:[#allocation10_spill]] %s766_s21  ;;  %s938_s0 = sadd.s32 4294967295, %s770_s22   ;;  %s770_s22 = sphi %s815_s22, %s21_s22   ;;  %s766_s21 = sphi %s813_s21, %s952_s21   ;;  %s762_s20 = sphi %s811_s20, %s951_s20   ;;  %s758_s19 = sphi %s809_s19, %s955_s19   ;;  %s754_s18 = sphi %s807_s18, %s954_s18   ;;  %s750_s17 = sphi %s805_s17, %s953_s17  }
   0xa   : > { %s33_s23 = sadd.s32 1, %s766_s21  ;;  %s63_s24 = sadd.s32 1, %s758_s19 }
   0xb   : > { %p35_p0 = scmp.ge.s32.totalorder %s33_s23, 2  ;;  %p70_p1 = scmp.ne.s32.totalorder %s758_s19, %s754_s18 }
   0xc   : > { %p71_p2 = scmp.eq.s32.totalorder %s770_s22, 0  ;;  %p76_p4 = scmp.ne.s32.totalorder %s754_s18, %s750_s17 }
   0xd   : > { %s957_s23 = smov (%p35_p0, %s33_s23), 0  ;;  %p77_p5 = scmp.eq.s32.totalorder %s938_s0, 0 }
   0xe   : > { %943 = sst [smem:[#allocation11_spill]] %s957_s23  ;;  %p72_p3 = por %p71_p2, %p70_p1 }
   0xf   : > { %s60_s25 = ssub.s32 %s766_s21, %s957_s23  ;;  %p846_p7 = por %p77_p5, %p76_p4 }
  0x10   : > { %p61_p6 = scmp.eq.s32.totalorder %s60_s25, 0  ;;  %p568_p8 = scmp.lt.s32.totalorder %s770_s22, 2 }
  0x11   : > { %s855_s28 = sand.u32 1, %s758_s19   ;;  %s858_s29 = sshll.u32 %s766_s21, 3 }
  0x12   : > { %s852_s27 = scalar_select %p61_p6, %s758_s19, %s63_s24  }
  0x13   : > { %s538_s30 = sshll.u32 %s855_s28, 5  ;;  %p861_p9 = pnand %p568_p8, %p72_p3 }
  0x14   : > { %945 = sst [smem:[#allocation12_spill]] %s852_s27  ;;  %s207_s6 = sand.u32 1, %s770_s22  }
  0x15   : > { %s947_s2 = sld [smem:[#allocation13_spill]]  ;;  %s211_s11 = scalar_lea.vmem [#allocation5], %s538_s30 }
  0x16   : > { %s219_s12 = sshll.u32 %s211_s11, 4  ;;  %s208_s13 = scalar_lea.sflag [#allocation6], %s207_s6  ;;  %s220_s12 = int_to_ptr.vmem [resolvable:$true] %s219_s12 }
  0x17   : > { %s772_s14 = smov 256   ;;  %s773_s15 = smov 128  }
  0x18   : > { %s774_s16 = smov 8   ;;  %p544_p10 = scmp.ge.s32.totalorder %s770_s22, 1 }
  0x19   : > { %p247_p11 = scmp.lt.s32.totalorder %s770_s22, 3  ;;  %s194_s7 = scalar_lea.hbm %s934_s1, %s858_s29 }
  0x1a   : > { %s195_s8 = sshll.u32 %s194_s7, 4  ;;  %s189_s6 = scalar_lea.vmem [#allocation3], %s538_s30  ;;  %s196_s8 = int_to_ptr.hbm [resolvable:$true] %s195_s8 }
  0x1b   : > { %s216_s9 = scalar_lea.hbm %s947_s2, %s858_s29  ;;  %p874_p12 = pnand %p544_p10, %p247_p11 }
  0x1c   : > { %s217_s10 = sshll.u32 %s216_s9, 4  ;;  %s197_s9 = sshll.u32 %s189_s6, 4  ;;  %s218_s10 = int_to_ptr.hbm [resolvable:$true] %s217_s10  ;;  %s198_s9 = int_to_ptr.vmem [resolvable:$true] %s197_s9 }
  0x1d   : > { %564 = dma.hbm_to_vmem [thread:$0]  (!%p861_p9), %s218_s10, 512, %s220_s12, %s208_s13, %s772_s14, %s773_s15, %s774_s16  }
  0x1e   : > { %s186_s11 = scalar_lea.sflag [#allocation4], %s855_s28  ;;  %s542_s10 = sshll.u32 %s855_s28, 3 }
  0x1f   : > { %561 = dma.hbm_to_vmem [thread:$0]  (!%p861_p9), %s196_s8, 512, %s198_s9, %s186_s11, %s772_s14, %s773_s15, %s774_s16  }
  0x20   : > { %s238_s2 = scalar_lea.hbm %s936_s3, %s858_s29  ;;  %s233_s21 = scalar_lea.vmem [#allocation7], %s542_s10 }
  0x21   : > { %s240_s23 = sshll.u32 %s238_s2, 4  ;;  %s242_s27 = sshll.u32 %s233_s21, 4  ;;  %s241_s23 = int_to_ptr.hbm [resolvable:$true] %s240_s23  ;;  %s243_s27 = int_to_ptr.vmem [resolvable:$true] %s242_s27 }
  0x22   : > { %567 = dma.hbm_to_vmem [thread:$0]  (!%p861_p9), %s241_s23, 128, %s243_s27, %s208_s13  }
  0x23   : > { %251 = sbr.rel (%p874_p12) target bundleno = 344 (0x158), region = 36  ;;  %s895_s30 = sand.u32 (!%p874_p12), 1, %s754_s18  }
  0x24   : > { %s545_s28 = sshll.u32 (!%p874_p12), %s895_s30, 5  ;;  %s254_s14 = scalar_lea.sflag (!%p874_p12), [#allocation4], %s895_s30 }
  0x25   : > { %s257_s0 = scalar_lea.vmem (!%p874_p12), [#allocation3], %s545_s28 }
  0x28   : > { %741 = dma.done.wait (%p846_p7), %s254_s14, 512  }
  0x29   : > { %743 = vsyncadd (%p846_p7), %s254_s14, 4294966784  ;;  %s949_s2 = sadd.s32 4294967295, %s770_s22   ;;  %s267_s27 = scalar_lea.vmem [#allocation5], %s545_s28 }
  0x2a   : > { %s263_s21 = sand.u32 1, %s949_s2  }
  0x2b   : > { %s264_s23 = scalar_lea.sflag [#allocation6], %s263_s21 }
  0x2c   : > { %745 = dma.done.wait (%p846_p7), %s264_s23, 640  }
  0x2d   : > { %747 = vsyncadd (%p846_p7), %s264_s23, 4294966656  ;;  %v320_v0 = vld [vmem:[%s257_s0 + $0x18] sm:$0xff]  ;;  %v319_v2 = vld [vmem:[%s257_s0 + $0x10] sm:$0xff]  ;;  %vm331_vm0 = vcmask 261120   ;;  %v775_v16 = vmov 1.0   ;;  %s547_s26 = sshll.u32 %s895_s30, 3 }
  0x2e   : > { %v324_v1 = vld [vmem:[%s267_s27 + $0x18] sm:$0xff]  ;;  %v323_v4 = vld [vmem:[%s267_s27 + $0x10] sm:$0xff]  ;;  %v318_v5 = vld [vmem:[%s257_s0 + $0x8] sm:$0xff]  ;;  %v358_v7 = vmul.f32 %v320_v0, %v320_v0  ;;  %v357_v8 = vmul.f32 %v319_v2, %v319_v2  ;;  %s277_s29 = scalar_lea.vmem [#allocation7], %s547_s26  ;;  %s326_s5 = sld [smem:[#allocation2]]  ;;  %vm404_vm1 = vcmask 1043459  }
  0x2f   : > { %v330_v3 = vmul.f32 %v324_v1, %v320_v0  ;;  %v322_v6 = vld [vmem:[%s267_s27 + $0x8] sm:$0xff]  ;;  %v329_v9 = vmul.f32 %v323_v4, %v319_v2  ;;  %v317_v10 = vld [vmem:[%s257_s0] sm:$0xff]  ;;  %v356_v13 = vmul.f32 %v318_v5, %v318_v5  ;;  %p314_p13 = scmp.lt.s32.totalorder %s762_s20, 1  ;;  %vm412_vm2 = vcmask 0  }
  0x30   : > { %v321_v11 = vld [vmem:[%s267_s27] sm:$0xff]  ;;  %v328_v12 = vmul.f32 %v322_v6, %v318_v5  ;;  %371 = vmatpush.msra.mxu1 %v358_v7  ;;  %v355_v15 = vmul.f32 %v317_v10, %v317_v10  ;;  %v776_v41 = vmov 0.0  }
  0x31   : > { %347 = vmatpush.msra.mxu0 %v330_v3  ;;  %v327_v14 = vmul.f32 %v321_v11, %v317_v10  ;;  %v325_v17 = vld [vmem:[%s277_s29] sm:$0xff]  ;;  %s959_s20 = smov (!%p314_p13, %s762_s20), 1 }
  0x32   : > { %372 = vmatpush.msra.mxu1 %v357_v8  ;;  %v381_v18 = vrot.slane %v325_v17, 1  ;;  %v397_v35 = vrot.slane %v325_v17, 2  ;;  %s316_s16 = scalar_lea.vmem %s937_s4, %s959_s20 }
  0x33   : > { %348 = vmatpush.msra.mxu0 %v329_v9  ;;  %413 = vst.msk [vmem:[%s316_s16] sm:$0x1] %vm412_vm2, %v776_v41 }
  0x34   : > { %373 = vmatpush.msra.mxu1 %v356_v13  ;;  %v394_v29 = vstv %s326_s5 }
  0x35   : > { %349 = vmatpush.msra.mxu0 %v328_v12 }
  0x36   : > { %374 = vmatpush.msra.mxu1 %v355_v15 }
  0x37   : > { %350 = vmatpush.msra.mxu0 %v327_v14  ;;  %549 = vmatmul.msk.f32.vlgmr.msra.gmra.mxu1 %vm331_vm0, %v775_v16 }
  0x38   : > { %548 = vmatmul.msk.f32.vlgmr.msra.gmra.mxu0 %vm331_vm0, %v775_v16 }
  0x3a   : > { %v414_v43 = vld [vmem:[%s316_s16] sm:$0x1] }
  0xb4   : > { %v376_v28 = vpop.f32.mrf.mxu1 }
  0xb5   : > { %v352_v19 = vpop.f32.mrf.mxu0  ;;  %v395_v33 = vmul.f32 %v394_v29, %v376_v28 }
  0xb6   : > { %v379_v20 = vmul.f32 %v352_v19, %v325_v17 }
  0xb8   : > { %v383_v21 = vadd.f32 %v381_v18, %v379_v20 }
  0xba   : > { %v384_v22 = vsub.f32 0.0, %v383_v21 }
  0xbc   : > { %v386_v23 = vand.u32 2147483647, %v384_v22  ;;  %v385_v31 = vmax.f32 %v384_v22, 0.0 }
  0xbe   : > { %v387_v24 = vsub.f32 0.0, %v386_v23 }
  0xc0   : > { %v388_v25 = vmul.f32 1.442695, %v387_v24 }
  0xc2   : > { %622 = vpow2.f32 %v388_v25 }
  0xc8   : > { %v623_v26 = vpop.eup %622 }
  0xc9   : > { %v390_v27 = vadd.f32 1.0, %v623_v26 }
  0xcb   : > { %624 = vlog2.f32 %v390_v27 }
  0xd1   : > { %v625_v30 = vpop.eup %624 }
  0xd2   : > { %v392_v32 = vmul.f32 0.6931472, %v625_v30 }
  0xd4   : > { %v393_v34 = vadd.f32 %v392_v32, %v385_v31 }
  0xd6   : > { %v396_v36 = vadd.f32 %v395_v33, %v393_v34 }
  0xd8   : > { %v399_v37 = vadd.f32 %v397_v35, %v396_v36 }
  0xda   : > { %v401_v38 = vrot.slane %v399_v37, 5 }
  0xdc   : > { %v403_v39 = vmul.f32 %v401_v38, %v325_v17 }
  0xde   : > { %v405_v40 = vsel %vm404_vm1, %v403_v39, 0.0 }
  0xdf   : > { %406 = vadd.xlane.f32.xlu0 %v405_v40 }
 0x152   : > { %v407_v42 = vpop.xlane.xlu0 %406 }
 0x153   : > { %v416_v44 = vperm.slane %v407_v42, 3 }
 0x155   : > { %v418_v45 = vadd.f32 %v416_v44, %v414_v43 }
 0x157   : > { %420 = vst.msk [vmem:[%s316_s16] sm:$0x1] %vm412_vm2, %v418_v45 }
 0x158 PF: > { %s21_s22 = sadd.s32 1, %s770_s22   ;;  %s950_s24 = sld [smem:[#allocation12_spill]] }
 0x159   : > { %p18_p0 = scmp.ge.s32.totalorder %s21_s22, 4   ;;  %s951_s20 = sld [smem:[#allocation10_spill]] }
 0x15a   : > { %s952_s21 = sld [smem:[#allocation11_spill]]  ;;  %s953_s17 = smov %s754_s18 }
 0x15b   : > { %s954_s18 = smov %s758_s19  ;;  %20 = sbr.rel (!%p18_p0) target bundleno = 9 (0x9), region = 104 }
 0x15e   : > { %s955_s19 = smov %s950_s24 }
 0x160   :  { %438 = vsyncpa [#allocation4], 1 }
 0x161   :  { %440 = vsyncpa [#allocation4 + $0x1], 1 }
 0x162   :  { %441 = vsyncpa [#allocation6], 1 }
 0x163   :  { %443 = vsyncpa [#allocation6 + $0x1], 1 }

</bundles_post_ra>
